<compile_context>
chip_gen: v7x
topology: tpu7x:2x2x1
jax: 0.10.0
libtpu: 0.0.40
codegen_flags: <defaults>
</compile_context>

<pallas_src>
import functools

import jax
import jax.numpy as jnp
from jax.experimental import pallas as pl
from jax.experimental.pallas import tpu as pltpu


def _pooler_kernel(x_ref, w_ref, b_ref, o_ref, *, tn):
    # x_ref : [Bp, H]   CLS tokens (batch padded), resident in VMEM across tiles.
    # w_ref : [TN, H]   weight rows ("out" features) for this tile, PyTorch [out, in].
    # b_ref : [1, Ho]   full bias, resident; sliced per tile in-kernel.
    # o_ref : [Bp, TN]  pooled output tile.
    j = pl.program_id(0)

    x = x_ref[...]
    w = w_ref[...]
    if x.dtype != w.dtype:
        # Mixed-dtype MXU operands are not guaranteed to lower; promote both to f32.
        x = x.astype(jnp.float32)
        w = w.astype(jnp.float32)

    # out = x @ W.T : contract x dim 1 (H) with w dim 1 (the "in" dim).
    # MXU matmul with f32 accumulation; no host-side transpose of the weight.
    y = jax.lax.dot_general(
        x, w,
        dimension_numbers=(((1,), (1,)), ((), ())),
        preferred_element_type=jnp.float32,
    )

    # Resident bias: slice the matching TN features (128-aligned when grid > 1).
    if b_ref.shape[-1] == tn:
        b = b_ref[...]
    else:
        start = pl.multiple_of(j * tn, 128)
        b = b_ref[:, pl.ds(start, tn)]
    y = y + b.astype(jnp.float32)

    # Exact GELU (erf formulation), matching torch.nn.functional.gelu default.
    inv_sqrt2 = 0.7071067811865476
    o_ref[...] = (0.5 * y * (1.0 + jax.lax.erf(y * inv_sqrt2))).astype(o_ref.dtype)


def _tpu_generation():
    """Best-effort device-kind string and per-TensorCore physical VMEM bytes."""
    kind = ""
    try:
        kind = jax.devices()[0].device_kind.lower()
    except Exception:
        pass
    if "v7" in kind or "7x" in kind:
        vmem_phys = 64 * 1024 * 1024       # v7x: 64 MiB per TC
    else:
        vmem_phys = 128 * 1024 * 1024      # v4 / v5e / v5p / v6e: 128 MiB
    return kind, vmem_phys


def _slab_cap_bytes(kind: str) -> int:
    """Target cap on a single weight slab (single buffer) per generation."""
    if "v5" in kind and ("lite" in kind or "v5e" in kind):
        return 6 << 20     # v5e: ~0.82 TB/s HBM, small tiles already amortize overhead
    if "v6" in kind:
        return 16 << 20    # v6e: 128 MiB physical VMEM, go large
    if "v7" in kind or "7x" in kind:
        return 12 << 20    # v7x: 64 MiB physical per TC -> keep 2x slab <= 24 MiB
    return 8 << 20         # unknown / v4 / v5p: conservative


def _pick_tile_n(h_out: int, h_in: int, w_bytes: int,
                 slab_cap_bytes: int, prefer_even_grid: bool) -> int:
    """Largest multiple-of-128 divisor of h_out whose slab fits the VMEM cap,
    preferring grid >= 2 (pipelining) and, on v7x, an even grid (2-TC split)."""
    cands = [d for d in range(128, h_out + 1, 128) if h_out % d == 0]
    cands.sort(reverse=True)
    fitting = [c for c in cands if c * h_in * w_bytes <= slab_cap_bytes]
    if not fitting:
        fitting = [cands[-1]]   # smallest (128); vmem_limit below still covers it

    if prefer_even_grid:
        pool = [c for c in fitting if (h_out // c) >= 2 and (h_out // c) % 2 == 0]
        if pool:
            return pool[0]
    pool = [c for c in fitting if (h_out // c) >= 2]
    if pool:
        return pool[0]
    return fitting[0]


def pooler_forward(hidden_states, weight, bias, *, weight_stream_dtype=None):
    """hidden_states: [B, S, H]; weight: [H, H] (PyTorch nn.Linear [out, in]);
    bias: [H].  Returns [B, H] = gelu(hidden_states[:, 0] @ weight.T + bias).

    weight_stream_dtype: optionally stream the weight in a narrower dtype
    (e.g. jnp.bfloat16) to halve the dominant HBM byte stream; accumulation and
    GELU stay in f32.  Off by default to match PyTorch f32 numerics exactly."""
    B, S, H = hidden_states.shape
    assert weight.shape == (H, H)
    assert bias.shape == (H,)

    # TODO(synk): StableDropout is identity at inference; training-mode dropout
    # (scaled Bernoulli mask) is not implemented here.

    if weight_stream_dtype is not None and weight.dtype != weight_stream_dtype:
        weight = weight.astype(weight_stream_dtype)

    context = hidden_states[:, 0, :]                       # [B, H]
    o_dtype = hidden_states.dtype

    x_bytes = jnp.dtype(context.dtype).itemsize
    o_bytes = jnp.dtype(o_dtype).itemsize
    w_bytes = jnp.dtype(weight.dtype).itemsize
    b_bytes = jnp.dtype(bias.dtype).itemsize

    # Pad the batch to the dtype's sublane packing (8 for 4B, 16 for 2B, 32 for 1B)
    # so output stores are unmasked and the MXU gets full LHS rows.
    pack = max(32 // x_bytes, 32 // o_bytes, 8)
    Bp = ((B + pack - 1) // pack) * pack
    if Bp != B:
        context = jnp.pad(context, ((0, Bp - B), (0, 0)))

    # Pad the OUT-feature dim to a multiple of 128 lanes (only when needed) so
    # every weight slab / output tile is lane-dense and grid=1 full-H blocks are
    # never forced for awkward H.  One-time O(H^2) cost, only when H % 128 != 0.
    Ho = ((H + 127) // 128) * 128
    if Ho != H:
        weight = jnp.pad(weight, ((0, Ho - H), (0, 0)))
        bias = jnp.pad(bias, (0, Ho - H))
    bias2d = bias.reshape(1, Ho)

    kind, vmem_phys = _tpu_generation()
    slab_cap = _slab_cap_bytes(kind)
    prefer_even_grid = ("v7" in kind) or ("7x" in kind)
    tn = _pick_tile_n(Ho, H, w_bytes, slab_cap, prefer_even_grid)
    grid_n = Ho // tn

    # Explicit VMEM budget from the actual buffer math (conservatively count two
    # buffers for every operand) plus headroom for internal scratch.
    vmem_needed = (2 * tn * H * w_bytes          # double-buffered weight slab
                   + 2 * Bp * H * x_bytes        # resident x
                   + 2 * Bp * tn * o_bytes       # output tile
                   + 2 * Ho * b_bytes)           # resident bias
    vmem_limit = int(min(max(vmem_needed + (2 << 20), 32 << 20),
                         int(vmem_phys * 0.9)))

    cost = pl.CostEstimate(
        flops=2 * Bp * Ho * H,
        transcendentals=Bp * Ho,
        bytes_accessed=(Ho * H * w_bytes         # weight stream (dominant)
                        + Bp * H * x_bytes       # x read
                        + Bp * Ho * o_bytes      # output write
                        + Ho * b_bytes),         # bias read
    )

    out = pl.pallas_call(
        functools.partial(_pooler_kernel, tn=tn),
        out_shape=jax.ShapeDtypeStruct((Bp, Ho), o_dtype),
        grid_spec=pltpu.PrefetchScalarGridSpec(
            num_scalar_prefetch=0,
            grid=(grid_n,),
            in_specs=[
                # x stays resident in VMEM across all output tiles.
                pl.BlockSpec((Bp, H), lambda j: (0, 0)),
                # Weight row slab j (TN out features x H in features), streamed
                # and double-buffered by the pipeline.
                pl.BlockSpec((tn, H), lambda j: (j, 0)),
                # Full bias, resident; sliced in-kernel (no per-step tiny DMAs).
                pl.BlockSpec((1, Ho), lambda j: (0, 0)),
            ],
            out_specs=pl.BlockSpec((Bp, tn), lambda j: (0, j)),
        ),
        compiler_params=pltpu.CompilerParams(
            # Output tiles are independent -> v7x's two TensorCores split the
            # weight slabs; harmless on single-TC v5e/v6e.
            dimension_semantics=("parallel",),
            vmem_limit_bytes=vmem_limit,
        ),
        cost_estimate=cost,
    )(context, weight, bias2d)

    if Bp != B or Ho != H:
        out = out[:B, :H]
    return out


if __name__ == "__main__":
    key = jax.random.PRNGKey(0)
    B, S, H = 2, 8, 32

    k_x, k_w, k_b = jax.random.split(key, 3)
    hidden_states = jax.random.normal(k_x, (B, S, H), dtype=jnp.float32)
    # Deterministic synthetic parameters (shapes from nn.Linear(H, H)).
    weight = jax.random.normal(k_w, (H, H), dtype=jnp.float32) * (1.0 / jnp.sqrt(H))
    bias = jax.random.normal(k_b, (H,), dtype=jnp.float32) * 0.01

    out = pooler_forward(hidden_states, weight, bias)
    out = jax.block_until_ready(out)

    # Plain-JAX reference for a sanity check.
    ctx = hidden_states[:, 0, :]
    ref = ctx @ weight.T + bias
    ref = 0.5 * ref * (1.0 + jax.lax.erf(ref * 0.7071067811865476))

    assert out.shape == (B, H)
    assert jnp.allclose(out, ref, atol=1e-5, rtol=1e-5), float(jnp.max(jnp.abs(out - ref)))

    print("KERNEL_OK")
</pallas_src>

<mosaic_0001>
module attributes {stable_mosaic.version = 11 : i64} {
  func.func @_pooler_kernel(%arg0: i32, %arg1: memref<8x32xf32, #tpu.memory_space<vmem>>, %arg2: memref<128x32xf32, #tpu.memory_space<vmem>>, %arg3: memref<1x128xf32, #tpu.memory_space<vmem>>, %arg4: memref<8x128xf32, #tpu.memory_space<vmem>>) attributes {dimension_semantics = [#tpu.dimension_semantics<parallel>], iteration_bounds = array<i64: 1>, scalar_prefetch = 0 : i64, scratch_operands = 0 : i64, tpu.core_type = #tpu.core_type<tc>, window_params = [{pipeline_mode = #tpu.pipeline_mode<synchronous>, transform_indices = @transform_0, window_bounds = array<i64: 8, 32>}, {transform_indices = @transform_1, window_bounds = array<i64: 128, 32>}, {pipeline_mode = #tpu.pipeline_mode<synchronous>, transform_indices = @transform_2, window_bounds = array<i64: 1, 128>}, {transform_indices = @transform_3, window_bounds = array<i64: 8, 128>}]} {
    %c0 = arith.constant 0 : index
    %c0_0 = arith.constant 0 : index
    %0 = vector.load %arg1[%c0, %c0_0] : memref<8x32xf32, #tpu.memory_space<vmem>>, vector<8x32xf32>
    %c0_1 = arith.constant 0 : index
    %c0_2 = arith.constant 0 : index
    %1 = vector.load %arg2[%c0_1, %c0_2] : memref<128x32xf32, #tpu.memory_space<vmem>>, vector<128x32xf32>
    %cst = arith.constant dense<0.000000e+00> : vector<8x128xf32>
    %2 = tpu.matmul %0, %1, %cst {dimension_numbers = #tpu.dot_dimension_numbers<[1], [1], [0], [0], [0, 0, 1, 0], [], []>} : vector<8x32xf32>, vector<128x32xf32>, vector<8x128xf32> -> vector<8x128xf32>
    %c0_3 = arith.constant 0 : index
    %c0_4 = arith.constant 0 : index
    %3 = vector.load %arg3[%c0_3, %c0_4] : memref<1x128xf32, #tpu.memory_space<vmem>>, vector<1x128xf32>
    %4 = vector.broadcast %3 : vector<1x128xf32> to vector<8x128xf32>
    %5 = arith.addf %2, %4 : vector<8x128xf32>
    %cst_5 = arith.constant 5.000000e-01 : f32
    %6 = vector.broadcast %cst_5 : f32 to vector<8x128xf32>
    %7 = arith.mulf %6, %5 : vector<8x128xf32>
    %cst_6 = arith.constant 0.707106769 : f32
    %8 = vector.broadcast %cst_6 : f32 to vector<8x128xf32>
    %9 = arith.mulf %5, %8 : vector<8x128xf32>
    %10 = math.erf %9 : vector<8x128xf32>
    %cst_7 = arith.constant 1.000000e+00 : f32
    %11 = vector.broadcast %cst_7 : f32 to vector<8x128xf32>
    %12 = arith.addf %11, %10 : vector<8x128xf32>
    %13 = arith.mulf %7, %12 : vector<8x128xf32>
    %c0_8 = arith.constant 0 : index
    %c0_9 = arith.constant 0 : index
    %14 = vector.load %arg4[%c0_8, %c0_9] : memref<8x128xf32, #tpu.memory_space<vmem>>, vector<8x128xf32>
    tpu.vector_store %arg4[%c0_8, %c0_9], %13 {strides = array<i32>} : memref<8x128xf32, #tpu.memory_space<vmem>>, vector<8x128xf32>,
    return
  }
  func.func @transform_0(%arg0: i32) -> (i32, i32) {
    %c0_i32 = arith.constant 0 : i32
    %c0_i32_0 = arith.constant 0 : i32
    %c0_i32_1 = arith.constant 0 : i32
    return %c0_i32, %c0_i32_0 : i32, i32
  }
  func.func @transform_1(%arg0: i32) -> (i32, i32) {
    %c0_i32 = arith.constant 0 : i32
    %c0_i32_0 = arith.constant 0 : i32
    return %arg0, %c0_i32 : i32, i32
  }
  func.func @transform_2(%arg0: i32) -> (i32, i32) {
    %c0_i32 = arith.constant 0 : i32
    %c0_i32_0 = arith.constant 0 : i32
    %c0_i32_1 = arith.constant 0 : i32
    return %c0_i32, %c0_i32_0 : i32, i32
  }
  func.func @transform_3(%arg0: i32) -> (i32, i32) {
    %c0_i32 = arith.constant 0 : i32
    %c0_i32_0 = arith.constant 0 : i32
    return %c0_i32, %arg0 : i32, i32
  }
}

</mosaic_0001>

<bundles_post_ra>
// kernel: tpu_custom_call.1
= control target key start
LH: loop header
LB: loop body
LE: loop exit
PB: predicated region body
PF: predicated region fallthrough
CT: control target
= control target key end

     0   :  { %vm39_vm0 = vcmask 261120   ;;  %v313_v2 = vmov 0.0|0.0   ;;  %vm314_vm2 = vmmov 0   ;;  %v315_v5 = vmov 0.0   ;;  %s426_s0 = inlined_call_operand.vmem [shape: f32[8,32], index: 0, kind: input, shape index: {}]   ;;  %s427_s1 = inlined_call_operand.vmem [shape: f32[128,32], index: 1, kind: input, shape index: {}]   ;;  %s428_s2 = inlined_call_operand.vmem [shape: f32[1,128], index: 2, kind: input, shape index: {}]   ;;  %s429_s3 = inlined_call_operand.hbm [shape: f32[8,128], index: 3, kind: output, shape index: {}]  }
   0x1   :  { %v16_v0 = vld [vmem:[%s427_s1] sm:$0xff]  ;;  %v17_v1 = vld [vmem:[%s427_s1 + $0x8] sm:$0xff]  ;;  %251 = vmatprep.subr.bf16.mxu0 %v313_v2  ;;  %vm345_vm1 = vmpackc.low %vm39_vm0, %vm39_vm0  ;;  %248 = vmatprep.mubr.msk.f32.mxu0 %vm314_vm2, %v315_v5 }
   0x2   :  { %v252_v3 = vpack.c.bf16 %v17_v1, %v16_v0  ;;  %v18_v6 = vld [vmem:[%s427_s1 + $0x10] sm:$0xff]  ;;  %v19_v7 = vld [vmem:[%s427_s1 + $0x18] sm:$0xff] }
   0x4   :  { %254 = vmatpush3.bf16.xpose.msk.msra.mxu0 %vm345_vm1, %v252_v3 }
   0x5   :  { %255 = vmatprep.subr.bf16.mxu0 %v313_v2 }
   0x6   :  { %8 = vsyncpa [#allocation3], 0  ;;  %v256_v8 = vpack.c.bf16 %v19_v7, %v18_v6  ;;  %v20_v9 = vld [vmem:[%s427_s1 + $0x20] sm:$0xff]  ;;  %v21_v10 = vld [vmem:[%s427_s1 + $0x28] sm:$0xff] }
   0x7   :  { %v260_v11 = vpack.c.bf16 %v21_v10, %v20_v9  ;;  %v22_v12 = vld [vmem:[%s427_s1 + $0x30] sm:$0xff]  ;;  %v23_v13 = vld [vmem:[%s427_s1 + $0x38] sm:$0xff]  ;;  %v24_v15 = vld [vmem:[%s427_s1 + $0x40] sm:$0xff] }
   0x8   :  { %v264_v14 = vpack.c.bf16 %v23_v13, %v22_v12  ;;  %v25_v16 = vld [vmem:[%s427_s1 + $0x48] sm:$0xff]  ;;  %v26_v18 = vld [vmem:[%s427_s1 + $0x50] sm:$0xff]  ;;  %v27_v19 = vld [vmem:[%s427_s1 + $0x58] sm:$0xff] }
   0x9   :  { %v268_v17 = vpack.c.bf16 %v25_v16, %v24_v15  ;;  %v272_v20 = vpack.c.bf16 %v27_v19, %v26_v18  ;;  %v28_v21 = vld [vmem:[%s427_s1 + $0x60] sm:$0xff]  ;;  %v29_v22 = vld [vmem:[%s427_s1 + $0x68] sm:$0xff]  ;;  %v30_v24 = vld [vmem:[%s427_s1 + $0x70] sm:$0xff] }
   0xa   :  { %v276_v23 = vpack.c.bf16 %v29_v22, %v28_v21  ;;  %v31_v25 = vld [vmem:[%s427_s1 + $0x78] sm:$0xff]  ;;  %v15_v27 = vld [vmem:[%s426_s0] sm:$0xff]  ;;  %s316_s1 = smov [#allocation2]  }
   0xb   :  { %v280_v26 = vpack.c.bf16 %v31_v25, %v30_v24  ;;  %v181_v28 = vld [vmem:[%s428_s2] ss:$0 sm:$0xff]  ;;  %s173_s21 = sshll.u32 %s316_s1, 4  ;;  %s174_s21 = int_to_ptr.vmem [resolvable:$true] %s173_s21 }
   0xc   :  { %258 = vmatpush3.bf16.xpose.msk.msra.mxu0 %vm345_vm1, %v256_v8  ;;  %s289_s0 = scalar_lea.vmem %s174_s21, 128  ;;  %p294_p1 = scmp.lt.s32.totalorder %s174_s21, %s174_s21 }
   0xd   :  { %259 = vmatprep.subr.bf16.mxu0 %v313_v2  ;;  %p290_p0 = scmp.ne.s32.totalorder %s174_s21, %s289_s0  ;;  %p295_p2 = scmp.lt.s32.totalorder %s289_s0, %s289_s0 }
   0xf   :  { %p296_p3 = por %p295_p2, %p294_p1 }
  0x11   :  { %p297_p4 = pnand %p296_p3, %p290_p0 }
  0x14   :  { %262 = vmatpush3.bf16.xpose.msk.msra.mxu0 %vm345_vm1, %v260_v11 }
  0x15   :  { %263 = vmatprep.subr.bf16.mxu0 %v313_v2 }
  0x1c   :  { %266 = vmatpush3.bf16.xpose.msk.msra.mxu0 %vm345_vm1, %v264_v14 }
  0x1d   :  { %267 = vmatprep.subr.bf16.mxu0 %v313_v2 }
  0x24   :  { %270 = vmatpush3.bf16.xpose.msk.msra.mxu0 %vm345_vm1, %v268_v17 }
  0x25   :  { %271 = vmatprep.subr.bf16.mxu0 %v313_v2 }
  0x2c   :  { %274 = vmatpush3.bf16.xpose.msk.msra.mxu0 %vm345_vm1, %v272_v20 }
  0x2d   :  { %275 = vmatprep.subr.bf16.mxu0 %v313_v2 }
  0x34   :  { %278 = vmatpush3.bf16.xpose.msk.msra.mxu0 %vm345_vm1, %v276_v23 }
  0x35   :  { %279 = vmatprep.subr.bf16.mxu0 %v313_v2 }
  0x3c   :  { %282 = vmatpush3.bf16.xpose.msk.msra.mxu0 %vm345_vm1, %v280_v26 }
  0x43   :  { %249 = vmatmul.mubr.msk.f32.vlgmr.msra.gmra.mrb[0].mxu0 %vm39_vm0, %v15_v27 }
 0x116   :  { %v157_v29 = vpop.f32.mrb[0].mxu0 }
 0x117   :  { %v158_v30 = vadd.f32 %v181_v28, %v157_v29  ;;  %v250_v31 = vpop.f32.mrb[1].mxu0 }
 0x119   :  { %v162_v32 = vmul.f32 0.70710677, %v158_v30  ;;  %v161_v34 = vmul.f32 0.5, %v158_v30 }
 0x11b   :  { %287 = verf.f32 %v162_v32 }
 0x125   :  { %v288_v33 = vpop.eup %287 }
 0x126   :  { %v164_v35 = vadd.f32 1.0, %v288_v33 }
 0x128   :  { %v165_v36 = vmul.f32 %v164_v35, %v161_v34 }
 0x12a   :  { %166 = vst [vmem:[#allocation2] sm:$0xff] %v165_v36 }
 0x12b   :  { %300 = shalt.err (!%p297_p4)
}
 0x12c   :  { %s301_s23 = scalar_lea.hbm %s429_s3, 128 }
 0x12d   :  { %p302_p5 = scmp.ne.s32.totalorder %s429_s3, %s301_s23  ;;  %p305_p6 = scmp.lt.u32.totalorder %s301_s23, %s429_s3 }
 0x12f   :  { %p307_p7 = pnand %p305_p6, %p302_p5 }
 0x131   :  { %310 = shalt.err (!%p307_p7)
}
 0x132   :  { %176 = dma.vmem_to_hbm [thread:$0]  %s174_s21, 128, %s429_s3, [#allocation3]  }
 0x133   :  { %311 = dma.done.wait [#allocation3], 128  }
 0x134   :  { %312 = vsyncadd [#allocation3], 4294967168 }
 0x135   :  { %180 = vsyncpa [#allocation3], 1 }

</bundles_post_ra>
